<compile_context>
chip_gen: v7x
topology: tpu7x:2x2x1
jax: 0.10.0
libtpu: 0.0.40
codegen_flags: <defaults>
</compile_context>

<pallas_src>
import functools
import math

import jax
import jax.numpy as jnp
from jax.experimental import pallas as pl
from jax.experimental.pallas import tpu as pltpu


def _round8(n):
    return ((n + 7) // 8) * 8


def critic_kernel(x_ref, w1_ref, b1_ref, w2_ref, b2_ref,
                  w3_ref, b3_ref, w4_ref, b4_ref, out_ref):
    """Fused 4-layer MLP on one lane-packed batch tile. All f32; weights resident."""
    x = x_ref[...]                                                        # (TR, P*D)
    h = jnp.dot(x, w1_ref[...], preferred_element_type=jnp.float32) + b1_ref[...]
    h = jnp.maximum(h, 0.0)
    h = jnp.dot(h, w2_ref[...], preferred_element_type=jnp.float32) + b2_ref[...]
    h = jnp.maximum(h, 0.0)
    h = jnp.dot(h, w3_ref[...], preferred_element_type=jnp.float32) + b3_ref[...]
    h = jnp.maximum(h, 0.0)
    v = jnp.dot(h, w4_ref[...], preferred_element_type=jnp.float32) + b4_ref[...]
    out_ref[...] = v.astype(out_ref.dtype)                               # (TR, P) lane-packed values


@functools.partial(jax.jit, static_argnames=("block_b",))
def critic_forward(state, params, *, block_b=8192):
    """state: [B, state_dims] f32 -> value: [B, 1] f32.

    params: lane-packed block-diagonal weights from `prepare_params`:
      (w1_bd[P*D, P*H1], b1_t[1, P*H1], w2_bd[P*H1, P*H2], b2_t[1, P*H2],
       w3_bd[P*H2, P*H3], b3_t[1, P*H3], w4_bd[P*H3, P], b4_t[1, P])
    """
    w1, b1, w2, b2, w3, b3, w4, b4 = params
    B, D = state.shape
    pack = w1.shape[0] // D                       # rows packed per 128-lane vector row

    # Pad batch to a multiple of `pack`, then lane-pack: (B, D) -> (R, pack*D).
    b_pk = pl.cdiv(B, pack) * pack
    if b_pk != B:
        state = jnp.pad(state, ((0, b_pk - B), (0, 0)))
    R = b_pk // pack
    xp = state.reshape(R, pack * D)

    # Packed-row tile size: multiple of 8 sublanes, capped by block_b original rows.
    tr = max(8, min(block_b // pack, _round8(R)))
    tr = _round8(tr)
    # Guarantee >= 2 grid steps when there is enough work, so the "parallel"
    # batch axis can shard across both TensorCores on v7x.
    if R >= 16:
        tr = min(tr, _round8(pl.cdiv(R, 2)))

    num_tiles = pl.cdiv(R, tr)
    r_pad = num_tiles * tr
    if r_pad != R:
        xp = jnp.pad(xp, ((0, r_pad - R), (0, 0)))

    def resident(arr):
        # Same block index every grid step -> weight/bias stays in VMEM.
        return pl.BlockSpec(arr.shape, lambda i: (0, 0))

    out = pl.pallas_call(
        critic_kernel,
        out_shape=jax.ShapeDtypeStruct((r_pad, pack), jnp.float32),
        grid=(num_tiles,),
        in_specs=[
            pl.BlockSpec((tr, pack * D), lambda i: (i, 0)),   # state tile (pipelined)
            resident(w1), resident(b1),
            resident(w2), resident(b2),
            resident(w3), resident(b3),
            resident(w4), resident(b4),
        ],
        out_specs=pl.BlockSpec((tr, pack), lambda i: (i, 0)),
        compiler_params=pltpu.CompilerParams(
            dimension_semantics=("parallel",),     # shard batch tiles across TCs (v7x)
            vmem_limit_bytes=48 << 20,             # room for big tiles; < v7x 64 MiB physical
        ),
    )(xp, w1, b1, w2, b2, w3, b3, w4, b4)

    # Lane-unpack: row r holds values of original rows r*pack .. r*pack+pack-1.
    return out.reshape(-1, 1)[:B]


def init_linear(key, fan_in, fan_out):
    """Deterministic init mimicking PyTorch nn.Linear default (U(-k, k), k=1/sqrt(fan_in)).
    Returns weight as [in, out] f32 and bias as [1, out] f32."""
    kw, kb = jax.random.split(key)
    bound = 1.0 / math.sqrt(float(fan_in))
    w = jax.random.uniform(kw, (fan_in, fan_out), jnp.float32, -bound, bound)
    b = jax.random.uniform(kb, (1, fan_out), jnp.float32, -bound, bound)
    return w, b


def prepare_params(w1, b1, w2, b2, w3, b3, w4, b4):
    """Build lane-packed block-diagonal weights (f32 end-to-end).

    pack = 128 // state_dims when state_dims divides 128 (8 for state_dims=16),
    else 1 (falls back to the plain layout)."""
    D = w1.shape[0]
    pack = 128 // D if 128 % D == 0 else 1
    eye = jnp.eye(pack, dtype=jnp.float32)

    def bd(w):
        return jnp.kron(eye, w.astype(jnp.float32))

    def tile_b(b):
        return jnp.tile(b.reshape(1, -1).astype(jnp.float32), (1, pack))

    return (bd(w1), tile_b(b1),
            bd(w2), tile_b(b2),
            bd(w3), tile_b(b3),
            bd(w4), tile_b(b4))


def reference_forward(state, f32_params):
    """Plain-JAX f32 reference for correctness checking."""
    w1, b1, w2, b2, w3, b3, w4, b4 = f32_params
    x = jnp.maximum(state @ w1 + b1, 0.0)
    x = jnp.maximum(x @ w2 + b2, 0.0)
    x = jnp.maximum(x @ w3 + b3, 0.0)
    return x @ w4 + b4


if __name__ == "__main__":
    # Small shapes consistent with the module constructor:
    #   Critic(state_dims=16, fc1_dims=32, fc2_dims=32, fc3_dims=32, ...)
    # B=10 deliberately not a multiple of the lane-pack factor to exercise padding.
    B = 10
    state_dims, fc1_dims, fc2_dims, fc3_dims = 16, 32, 32, 32

    key = jax.random.PRNGKey(0)
    k_in, k1, k2, k3, k4 = jax.random.split(key, 5)

    state = jax.random.normal(k_in, (B, state_dims), jnp.float32)

    w1, b1 = init_linear(k1, state_dims, fc1_dims)
    w2, b2 = init_linear(k2, fc1_dims, fc2_dims)
    w3, b3 = init_linear(k3, fc2_dims, fc3_dims)
    w4, b4 = init_linear(k4, fc3_dims, 1)

    f32_params = (w1, b1, w2, b2, w3, b3, w4, b4)
    params = prepare_params(*f32_params)

    # Note: for per-env RL rollouts (tiny B), batch many states into one call —
    # the kernel is launch-overhead-bound below B of a few thousand.
    value = critic_forward(state, params, block_b=8192)
    value = jax.block_until_ready(value)

    ref = reference_forward(state, f32_params)
    assert value.shape == (B, 1), value.shape
    assert jnp.allclose(value, ref, atol=1e-2, rtol=1e-2), (value, ref)

    print("KERNEL_OK")
</pallas_src>

<mosaic_0001>
module attributes {stable_mosaic.version = 11 : i64} {
  func.func @critic_kernel(%arg0: i32, %arg1: memref<8x128xf32, #tpu.memory_space<vmem>>, %arg2: memref<128x256xf32, #tpu.memory_space<vmem>>, %arg3: memref<1x256xf32, #tpu.memory_space<vmem>>, %arg4: memref<256x256xf32, #tpu.memory_space<vmem>>, %arg5: memref<1x256xf32, #tpu.memory_space<vmem>>, %arg6: memref<256x256xf32, #tpu.memory_space<vmem>>, %arg7: memref<1x256xf32, #tpu.memory_space<vmem>>, %arg8: memref<256x8xf32, #tpu.memory_space<vmem>>, %arg9: memref<1x8xf32, #tpu.memory_space<vmem>>, %arg10: memref<8x8xf32, #tpu.memory_space<vmem>>) attributes {dimension_semantics = [#tpu.dimension_semantics<parallel>], iteration_bounds = array<i64: 1>, scalar_prefetch = 0 : i64, scratch_operands = 0 : i64, tpu.core_type = #tpu.core_type<tc>, window_params = [{transform_indices = @transform_0, window_bounds = array<i64: 8, 128>}, {pipeline_mode = #tpu.pipeline_mode<synchronous>, transform_indices = @transform_1, window_bounds = array<i64: 128, 256>}, {pipeline_mode = #tpu.pipeline_mode<synchronous>, transform_indices = @transform_2, window_bounds = array<i64: 1, 256>}, {pipeline_mode = #tpu.pipeline_mode<synchronous>, transform_indices = @transform_3, window_bounds = array<i64: 256, 256>}, {pipeline_mode = #tpu.pipeline_mode<synchronous>, transform_indices = @transform_4, window_bounds = array<i64: 1, 256>}, {pipeline_mode = #tpu.pipeline_mode<synchronous>, transform_indices = @transform_5, window_bounds = array<i64: 256, 256>}, {pipeline_mode = #tpu.pipeline_mode<synchronous>, transform_indices = @transform_6, window_bounds = array<i64: 1, 256>}, {pipeline_mode = #tpu.pipeline_mode<synchronous>, transform_indices = @transform_7, window_bounds = array<i64: 256, 8>}, {pipeline_mode = #tpu.pipeline_mode<synchronous>, transform_indices = @transform_8, window_bounds = array<i64: 1, 8>}, {transform_indices = @transform_9, window_bounds = array<i64: 8, 8>}]} {
    %c0 = arith.constant 0 : index
    %c0_0 = arith.constant 0 : index
    %0 = vector.load %arg1[%c0, %c0_0] : memref<8x128xf32, #tpu.memory_space<vmem>>, vector<8x128xf32>
    %c0_1 = arith.constant 0 : index
    %c0_2 = arith.constant 0 : index
    %1 = vector.load %arg2[%c0_1, %c0_2] : memref<128x256xf32, #tpu.memory_space<vmem>>, vector<128x256xf32>
    %cst = arith.constant dense<0.000000e+00> : vector<8x256xf32>
    %2 = tpu.matmul %0, %1, %cst {dimension_numbers = #tpu.dot_dimension_numbers<[1], [0], [0], [1], [0, 0, 1, 1], [], []>} : vector<8x128xf32>, vector<128x256xf32>, vector<8x256xf32> -> vector<8x256xf32>
    %c0_3 = arith.constant 0 : index
    %c0_4 = arith.constant 0 : index
    %3 = vector.load %arg3[%c0_3, %c0_4] : memref<1x256xf32, #tpu.memory_space<vmem>>, vector<1x256xf32>
    %4 = vector.broadcast %3 : vector<1x256xf32> to vector<8x256xf32>
    %5 = arith.addf %2, %4 : vector<8x256xf32>
    %cst_5 = arith.constant 0.000000e+00 : f32
    %6 = vector.broadcast %cst_5 : f32 to vector<8x256xf32>
    %7 = arith.maximumf %5, %6 : vector<8x256xf32>
    %c0_6 = arith.constant 0 : index
    %c0_7 = arith.constant 0 : index
    %8 = vector.load %arg4[%c0_6, %c0_7] : memref<256x256xf32, #tpu.memory_space<vmem>>, vector<256x256xf32>
    %cst_8 = arith.constant dense<0.000000e+00> : vector<8x256xf32>
    %9 = tpu.matmul %7, %8, %cst_8 {dimension_numbers = #tpu.dot_dimension_numbers<[1], [0], [0], [1], [0, 0, 1, 1], [], []>} : vector<8x256xf32>, vector<256x256xf32>, vector<8x256xf32> -> vector<8x256xf32>
    %c0_9 = arith.constant 0 : index
    %c0_10 = arith.constant 0 : index
    %10 = vector.load %arg5[%c0_9, %c0_10] : memref<1x256xf32, #tpu.memory_space<vmem>>, vector<1x256xf32>
    %11 = vector.broadcast %10 : vector<1x256xf32> to vector<8x256xf32>
    %12 = arith.addf %9, %11 : vector<8x256xf32>
    %cst_11 = arith.constant 0.000000e+00 : f32
    %13 = vector.broadcast %cst_11 : f32 to vector<8x256xf32>
    %14 = arith.maximumf %12, %13 : vector<8x256xf32>
    %c0_12 = arith.constant 0 : index
    %c0_13 = arith.constant 0 : index
    %15 = vector.load %arg6[%c0_12, %c0_13] : memref<256x256xf32, #tpu.memory_space<vmem>>, vector<256x256xf32>
    %cst_14 = arith.constant dense<0.000000e+00> : vector<8x256xf32>
    %16 = tpu.matmul %14, %15, %cst_14 {dimension_numbers = #tpu.dot_dimension_numbers<[1], [0], [0], [1], [0, 0, 1, 1], [], []>} : vector<8x256xf32>, vector<256x256xf32>, vector<8x256xf32> -> vector<8x256xf32>
    %c0_15 = arith.constant 0 : index
    %c0_16 = arith.constant 0 : index
    %17 = vector.load %arg7[%c0_15, %c0_16] : memref<1x256xf32, #tpu.memory_space<vmem>>, vector<1x256xf32>
    %18 = vector.broadcast %17 : vector<1x256xf32> to vector<8x256xf32>
    %19 = arith.addf %16, %18 : vector<8x256xf32>
    %cst_17 = arith.constant 0.000000e+00 : f32
    %20 = vector.broadcast %cst_17 : f32 to vector<8x256xf32>
    %21 = arith.maximumf %19, %20 : vector<8x256xf32>
    %c0_18 = arith.constant 0 : index
    %c0_19 = arith.constant 0 : index
    %22 = vector.load %arg8[%c0_18, %c0_19] : memref<256x8xf32, #tpu.memory_space<vmem>>, vector<256x8xf32>
    %cst_20 = arith.constant dense<0.000000e+00> : vector<8x8xf32>
    %23 = tpu.matmul %21, %22, %cst_20 {dimension_numbers = #tpu.dot_dimension_numbers<[1], [0], [0], [1], [0, 0, 1, 1], [], []>} : vector<8x256xf32>, vector<256x8xf32>, vector<8x8xf32> -> vector<8x8xf32>
    %c0_21 = arith.constant 0 : index
    %c0_22 = arith.constant 0 : index
    %24 = vector.load %arg9[%c0_21, %c0_22] : memref<1x8xf32, #tpu.memory_space<vmem>>, vector<1x8xf32>
    %25 = vector.broadcast %24 : vector<1x8xf32> to vector<8x8xf32>
    %26 = arith.addf %23, %25 : vector<8x8xf32>
    %c0_23 = arith.constant 0 : index
    %c0_24 = arith.constant 0 : index
    %27 = vector.load %arg10[%c0_23, %c0_24] : memref<8x8xf32, #tpu.memory_space<vmem>>, vector<8x8xf32>
    tpu.vector_store %arg10[%c0_23, %c0_24], %26 {strides = array<i32>} : memref<8x8xf32, #tpu.memory_space<vmem>>, vector<8x8xf32>,
    return
  }
  func.func @transform_0(%arg0: i32) -> (i32, i32) {
    %c0_i32 = arith.constant 0 : i32
    %c0_i32_0 = arith.constant 0 : i32
    return %arg0, %c0_i32 : i32, i32
  }
  func.func @transform_1(%arg0: i32) -> (i32, i32) {
    %c0_i32 = arith.constant 0 : i32
    %c0_i32_0 = arith.constant 0 : i32
    %c0_i32_1 = arith.constant 0 : i32
    return %c0_i32, %c0_i32_0 : i32, i32
  }
  func.func @transform_2(%arg0: i32) -> (i32, i32) {
    %c0_i32 = arith.constant 0 : i32
    %c0_i32_0 = arith.constant 0 : i32
    %c0_i32_1 = arith.constant 0 : i32
    return %c0_i32, %c0_i32_0 : i32, i32
  }
  func.func @transform_3(%arg0: i32) -> (i32, i32) {
    %c0_i32 = arith.constant 0 : i32
    %c0_i32_0 = arith.constant 0 : i32
    %c0_i32_1 = arith.constant 0 : i32
    return %c0_i32, %c0_i32_0 : i32, i32
  }
  func.func @transform_4(%arg0: i32) -> (i32, i32) {
    %c0_i32 = arith.constant 0 : i32
    %c0_i32_0 = arith.constant 0 : i32
    %c0_i32_1 = arith.constant 0 : i32
    return %c0_i32, %c0_i32_0 : i32, i32
  }
  func.func @transform_5(%arg0: i32) -> (i32, i32) {
    %c0_i32 = arith.constant 0 : i32
    %c0_i32_0 = arith.constant 0 : i32
    %c0_i32_1 = arith.constant 0 : i32
    return %c0_i32, %c0_i32_0 : i32, i32
  }
  func.func @transform_6(%arg0: i32) -> (i32, i32) {
    %c0_i32 = arith.constant 0 : i32
    %c0_i32_0 = arith.constant 0 : i32
    %c0_i32_1 = arith.constant 0 : i32
    return %c0_i32, %c0_i32_0 : i32, i32
  }
  func.func @transform_7(%arg0: i32) -> (i32, i32) {
    %c0_i32 = arith.constant 0 : i32
    %c0_i32_0 = arith.constant 0 : i32
    %c0_i32_1 = arith.constant 0 : i32
    return %c0_i32, %c0_i32_0 : i32, i32
  }
  func.func @transform_8(%arg0: i32) -> (i32, i32) {
    %c0_i32 = arith.constant 0 : i32
    %c0_i32_0 = arith.constant 0 : i32
    %c0_i32_1 = arith.constant 0 : i32
    return %c0_i32, %c0_i32_0 : i32, i32
  }
  func.func @transform_9(%arg0: i32) -> (i32, i32) {
    %c0_i32 = arith.constant 0 : i32
    %c0_i32_0 = arith.constant 0 : i32
    return %arg0, %c0_i32 : i32, i32
  }
}

</mosaic_0001>

<bundles_post_ra>
// kernel: critic_forward.1
= control target key start
LH: loop header
LB: loop body
LE: loop exit
PB: predicated region body
PF: predicated region fallthrough
CT: control target
= control target key end

     0   :  { %14 = vsyncpa [#allocation3], 0  ;;  %s1173_s0 = inlined_call_operand.vmem [shape: f32[8,128], index: 0, kind: input, shape index: {}]   ;;  %s1174_s1 = inlined_call_operand.vmem [shape: f32[128,256], index: 1, kind: input, shape index: {}]   ;;  %s1175_s2 = inlined_call_operand.vmem [shape: f32[1,256], index: 2, kind: input, shape index: {}]   ;;  %s1176_s3 = inlined_call_operand.hbm [shape: f32[256,256], index: 3, kind: input, shape index: {}]   ;;  %s1177_s4 = inlined_call_operand.vmem [shape: f32[1,256], index: 4, kind: input, shape index: {}]   ;;  %s1178_s5 = inlined_call_operand.hbm [shape: f32[256,256], index: 5, kind: input, shape index: {}]   ;;  %s1179_s6 = inlined_call_operand.vmem [shape: f32[1,256], index: 6, kind: input, shape index: {}]   ;;  %s1180_s7 = inlined_call_operand.vmem [shape: f32[256,8], index: 7, kind: input, shape index: {}]   ;;  %s1181_s8 = inlined_call_operand.vmem [shape: f32[1,8], index: 8, kind: input, shape index: {}]   ;;  %s1182_s9 = inlined_call_operand.vmem [shape: f32[8,8], index: 9, kind: output, shape index: {}]  }
   0x1   :  { %15 = vsyncpa [#allocation5], 0  ;;  %s874_s30 = smov [#allocation2]   ;;  %s826_s13 = scalar_lea.hbm %s1176_s3, 8192 }
   0x2   :  { %s27_s10 = sshll.u32 %s874_s30, 4  ;;  %p827_p0 = scmp.ne.s32.totalorder %s1176_s3, %s826_s13  ;;  %s28_s10 = int_to_ptr.vmem [resolvable:$true] %s27_s10 }
   0x3   :  { %p830_p1 = scmp.lt.u32.totalorder %s826_s13, %s1176_s3 }
   0x5   :  { %p832_p2 = pnand %p830_p1, %p827_p0 }
   0x7   :  { %835 = shalt.err (!%p832_p2)
}
   0x8   :  { %s836_s18 = scalar_lea.vmem %s28_s10, 8192  ;;  %p841_p4 = scmp.lt.s32.totalorder %s28_s10, %s28_s10 }
   0x9   :  { %p837_p3 = scmp.ne.s32.totalorder %s28_s10, %s836_s18  ;;  %p842_p5 = scmp.lt.s32.totalorder %s836_s18, %s836_s18 }
   0xb   :  { %p843_p6 = por %p842_p5, %p841_p4 }
   0xd   :  { %p844_p7 = pnand %p843_p6, %p837_p3 }
   0xf   :  { %847 = shalt.err (!%p844_p7)
}
  0x10   :  { %s875_s19 = smov 256   ;;  %s876_s20 = smov 16  }
  0x11   :  { %33 = dma.hbm_to_vmem [thread:$0]  %s1176_s3, 8192, %s28_s10, [#allocation3], %s875_s19, %s875_s19, %s876_s20  }
  0x12   :  { %s877_s23 = smov [#allocation4]   ;;  %s848_s27 = scalar_lea.hbm %s1178_s5, 8192 }
  0x13   :  { %s41_s24 = sshll.u32 %s877_s23, 4  ;;  %p849_p8 = scmp.ne.s32.totalorder %s1178_s5, %s848_s27  ;;  %s42_s24 = int_to_ptr.vmem [resolvable:$true] %s41_s24 }
  0x14   :  { %p852_p9 = scmp.lt.u32.totalorder %s848_s27, %s1178_s5 }
  0x16   :  { %p854_p10 = pnand %p852_p9, %p849_p8 }
  0x18   :  { %857 = shalt.err (!%p854_p10)
}
  0x19   :  { %s858_s12 = scalar_lea.vmem %s42_s24, 8192  ;;  %p863_p12 = scmp.lt.s32.totalorder %s42_s24, %s42_s24 }
  0x1a   :  { %p859_p11 = scmp.ne.s32.totalorder %s42_s24, %s858_s12  ;;  %p864_p13 = scmp.lt.s32.totalorder %s858_s12, %s858_s12 }
  0x1c   :  { %p865_p0 = por %p864_p13, %p863_p12 }
  0x1e   :  { %p866_p1 = pnand %p865_p0, %p859_p11 }
  0x20   :  { %869 = shalt.err (!%p866_p1)
}
  0x21   :  { %47 = dma.hbm_to_vmem [thread:$0]  %s1178_s5, 8192, %s42_s24, [#allocation5], %s875_s19, %s875_s19, %s876_s20  }
  0x22   :  { %870 = dma.done.wait [#allocation3], 8192  }
  0x23   :  { %871 = vsyncadd [#allocation3], 4294959104 }
  0x24   :  { %872 = dma.done.wait [#allocation5], 8192  }
  0x25   :  { %873 = vsyncadd [#allocation5], 4294959104  ;;  %v878_v0 = vmov 0.0   ;;  %v62_v1 = vld [vmem:[%s1174_s1 + $0x8] sm:$0xff]  ;;  %v64_v2 = vld [vmem:[%s1174_s1 + $0x18] sm:$0xff]  ;;  %vm585_vm0 = vcmask 64512  }
  0x26   :  { %169 = vmatprep.mubr.f32.mxu0 %v878_v0  ;;  %v61_v3 = vld [vmem:[%s1174_s1] sm:$0xff]  ;;  %v629_v4 = vpack.c.bf16 %v64_v2, %v62_v1  ;;  %v63_v5 = vld [vmem:[%s1174_s1 + $0x10] sm:$0xff]  ;;  %v66_v6 = vld [vmem:[%s1174_s1 + $0x28] sm:$0xff] }
  0x27   :  { %v68_v7 = vld [vmem:[%s1174_s1 + $0x38] sm:$0xff]  ;;  %v631_v8 = vpack.c.bf16 %v63_v5, %v61_v3  ;;  %v65_v10 = vld [vmem:[%s1174_s1 + $0x20] sm:$0xff]  ;;  %v67_v11 = vld [vmem:[%s1174_s1 + $0x30] sm:$0xff] }
  0x28   :  { %v633_v9 = vpack.c.bf16 %v68_v7, %v66_v6  ;;  %v70_v12 = vld [vmem:[%s1174_s1 + $0x48] sm:$0xff]  ;;  %630 = vmatprep.subr.bf16.mxu0 %v629_v4  ;;  %v72_v13 = vld [vmem:[%s1174_s1 + $0x58] sm:$0xff]  ;;  %v635_v14 = vpack.c.bf16 %v67_v11, %v65_v10  ;;  %v69_v16 = vld [vmem:[%s1174_s1 + $0x40] sm:$0xff] }
  0x29   :  { %632 = vmatpush1.bf16.msra.mxu0 %v631_v8  ;;  %v637_v15 = vpack.c.bf16 %v72_v13, %v70_v12  ;;  %v71_v17 = vld [vmem:[%s1174_s1 + $0x50] sm:$0xff]  ;;  %v74_v18 = vld [vmem:[%s1174_s1 + $0x68] sm:$0xff]  ;;  %v76_v19 = vld [vmem:[%s1174_s1 + $0x78] sm:$0xff] }
  0x2a   :  { %634 = vmatprep.subr.bf16.mxu0 %v633_v9  ;;  %v639_v20 = vpack.c.bf16 %v71_v17, %v69_v16  ;;  %v641_v21 = vpack.c.bf16 %v76_v19, %v74_v18  ;;  %v73_v22 = vld [vmem:[%s1174_s1 + $0x60] sm:$0xff]  ;;  %v75_v23 = vld [vmem:[%s1174_s1 + $0x70] sm:$0xff]  ;;  %v78_v24 = vld [vmem:[%s1174_s1 + $0x88] sm:$0xff] }
  0x2b   :  { %v80_v25 = vld [vmem:[%s1174_s1 + $0x98] sm:$0xff]  ;;  %v77_v26 = vld [vmem:[%s1174_s1 + $0x80] sm:$0xff]  ;;  %v79_v27 = vld [vmem:[%s1174_s1 + $0x90] sm:$0xff]  ;;  %v643_v31 = vpack.c.bf16 %v75_v23, %v73_v22 }
  0x2c   :  { %v179_v28 = vld [vmem:[#allocation2 + $0x8] sm:$0xff]  ;;  %v181_v29 = vld [vmem:[#allocation2 + $0x18] sm:$0xff]  ;;  %v178_v30 = vld [vmem:[#allocation2] sm:$0xff]  ;;  %v645_v36 = vpack.c.bf16 %v80_v25, %v78_v24  ;;  %v647_v46 = vpack.c.bf16 %v79_v27, %v77_v26 }
  0x2d   :  { %636 = vmatpush1.bf16.msra.mxu0 %v635_v14  ;;  %v661_v32 = vpack.c.bf16 %v181_v29, %v179_v28  ;;  %v180_v33 = vld [vmem:[#allocation2 + $0x10] sm:$0xff]  ;;  %v183_v34 = vld [vmem:[#allocation2 + $0x28] sm:$0xff]  ;;  %v185_v35 = vld [vmem:[#allocation2 + $0x38] sm:$0xff] }
  0x2e   :  { %638 = vmatprep.subr.bf16.mxu0 %v637_v15  ;;  %v663_v37 = vpack.c.bf16 %v180_v33, %v178_v30  ;;  %v665_v38 = vpack.c.bf16 %v185_v35, %v183_v34  ;;  %v182_v39 = vld [vmem:[#allocation2 + $0x20] sm:$0xff]  ;;  %v184_v40 = vld [vmem:[#allocation2 + $0x30] sm:$0xff]  ;;  %v187_v41 = vld [vmem:[#allocation2 + $0x48] sm:$0xff] }
  0x2f   :  { %v82_v42 = vld [vmem:[%s1174_s1 + $0xa8] sm:$0xff]  ;;  %v84_v43 = vld [vmem:[%s1174_s1 + $0xb8] sm:$0xff]  ;;  %662 = vmatprep.subr.bf16.mxu1 %v661_v32  ;;  %v667_v45 = vpack.c.bf16 %v184_v40, %v182_v39  ;;  %v81_v47 = vld [vmem:[%s1174_s1 + $0xa0] sm:$0xff] }
  0x30   :  { %v189_v44 = vld [vmem:[#allocation2 + $0x58] sm:$0xff]  ;;  %664 = vmatpush1.bf16.msra.mxu1 %v663_v37  ;;  %v186_v49 = vld [vmem:[#allocation2 + $0x40] sm:$0xff]  ;;  %v188_v50 = vld [vmem:[#allocation2 + $0x50] sm:$0xff]  ;;  %v649_v51 = vpack.c.bf16 %v84_v43, %v82_v42 }
  0x31   :  { %640 = vmatpush1.bf16.msra.mxu0 %v639_v20  ;;  %666 = vmatprep.subr.bf16.mxu1 %v665_v38  ;;  %v669_v48 = vpack.c.bf16 %v189_v44, %v187_v41  ;;  %v83_v52 = vld [vmem:[%s1174_s1 + $0xb0] sm:$0xff]  ;;  %v191_v53 = vld [vmem:[#allocation2 + $0x68] sm:$0xff]  ;;  %v193_v54 = vld [vmem:[#allocation2 + $0x78] sm:$0xff]  ;;  %v671_v57 = vpack.c.bf16 %v188_v50, %v186_v49 }
  0x32   :  { %642 = vmatprep.subr.bf16.mxu0 %v641_v21  ;;  %v86_v55 = vld [vmem:[%s1174_s1 + $0xc8] sm:$0xff]  ;;  %v88_v56 = vld [vmem:[%s1174_s1 + $0xd8] sm:$0xff]  ;;  %v651_v58 = vpack.c.bf16 %v83_v52, %v81_v47  ;;  %v85_v59 = vld [vmem:[%s1174_s1 + $0xc0] sm:$0xff]  ;;  %v673_v60 = vpack.c.bf16 %v193_v54, %v191_v53 }
  0x33   :  { %v190_v61 = vld [vmem:[#allocation2 + $0x60] sm:$0xff]  ;;  %v192_v62 = vld [vmem:[#allocation2 + $0x70] sm:$0xff]  ;;  %v653_v63 = vpack.c.bf16 %v88_v56, %v86_v55  ;;  %v195_v1 = vld [vmem:[#allocation2 + $0x88] sm:$0xff] }
  0x34   :  { %668 = vmatpush1.bf16.msra.mxu1 %v667_v45  ;;  %v87_v0 = vld [vmem:[%s1174_s1 + $0xd0] sm:$0xff]  ;;  %v197_v2 = vld [vmem:[#allocation2 + $0x98] sm:$0xff]  ;;  %v92_v4 = vld [vmem:[%s1174_s1 + $0xf8] sm:$0xff]  ;;  %v675_v5 = vpack.c.bf16 %v192_v62, %v190_v61 }
  0x35   :  { %644 = vmatpush1.bf16.msra.mxu0 %v643_v31  ;;  %670 = vmatprep.subr.bf16.mxu1 %v669_v48  ;;  %v90_v3 = vld [vmem:[%s1174_s1 + $0xe8] sm:$0xff]  ;;  %v655_v6 = vpack.c.bf16 %v87_v0, %v85_v59  ;;  %v89_v7 = vld [vmem:[%s1174_s1 + $0xe0] sm:$0xff]  ;;  %v677_v8 = vpack.c.bf16 %v197_v2, %v195_v1  ;;  %v194_v9 = vld [vmem:[#allocation2 + $0x80] sm:$0xff] }
  0x36   :  { %646 = vmatprep.subr.bf16.mxu0 %v645_v36  ;;  %v196_v10 = vld [vmem:[#allocation2 + $0x90] sm:$0xff]  ;;  %v657_v11 = vpack.c.bf16 %v92_v4, %v90_v3  ;;  %v91_v12 = vld [vmem:[%s1174_s1 + $0xf0] sm:$0xff]  ;;  %v199_v13 = vld [vmem:[#allocation2 + $0xa8] sm:$0xff] }
  0x37   :  { %v201_v14 = vld [vmem:[#allocation2 + $0xb8] sm:$0xff]  ;;  %v679_v15 = vpack.c.bf16 %v196_v10, %v194_v9  ;;  %v659_v16 = vpack.c.bf16 %v91_v12, %v89_v7  ;;  %v198_v18 = vld [vmem:[#allocation2 + $0xa0] sm:$0xff]  ;;  %v200_v19 = vld [vmem:[#allocation2 + $0xb0] sm:$0xff] }
  0x38   :  { %672 = vmatpush1.bf16.msra.mxu1 %v671_v57  ;;  %v681_v17 = vpack.c.bf16 %v201_v14, %v199_v13  ;;  %v203_v20 = vld [vmem:[#allocation2 + $0xc8] sm:$0xff]  ;;  %v205_v21 = vld [vmem:[#allocation2 + $0xd8] sm:$0xff]  ;;  %v683_v22 = vpack.c.bf16 %v200_v19, %v198_v18  ;;  %v60_v23 = vld [vmem:[%s1173_s0] sm:$0xff] }
  0x39   :  { %648 = vmatpush1.bf16.msra.mxu0 %v647_v46  ;;  %674 = vmatprep.subr.bf16.mxu1 %v673_v60  ;;  %v685_v24 = vpack.c.bf16 %v205_v21, %v203_v20  ;;  %v202_v25 = vld [vmem:[#allocation2 + $0xc0] sm:$0xff]  ;;  %v204_v26 = vld [vmem:[#allocation2 + $0xd0] sm:$0xff]  ;;  %v207_v27 = vld [vmem:[#allocation2 + $0xe8] sm:$0xff] }
  0x3a   :  { %650 = vmatprep.subr.bf16.mxu0 %v649_v51  ;;  %v209_v28 = vld [vmem:[#allocation2 + $0xf8] sm:$0xff]  ;;  %v687_v29 = vpack.c.bf16 %v204_v26, %v202_v25  ;;  %v206_v31 = vld [vmem:[#allocation2 + $0xe0] sm:$0xff]  ;;  %v208_v32 = vld [vmem:[#allocation2 + $0xf0] sm:$0xff] }
  0x3b   :  { %v689_v30 = vpack.c.bf16 %v209_v28, %v207_v27  ;;  %v211_v33 = vld [vmem:[#allocation2 + $0x108] sm:$0xff]  ;;  %v213_v34 = vld [vmem:[#allocation2 + $0x118] sm:$0xff]  ;;  %v691_v35 = vpack.c.bf16 %v208_v32, %v206_v31  ;;  %v210_v37 = vld [vmem:[#allocation2 + $0x100] sm:$0xff] }
  0x3c   :  { %676 = vmatpush1.bf16.msra.mxu1 %v675_v5  ;;  %v693_v36 = vpack.c.bf16 %v213_v34, %v211_v33  ;;  %v212_v38 = vld [vmem:[#allocation2 + $0x110] sm:$0xff]  ;;  %v215_v39 = vld [vmem:[#allocation2 + $0x128] sm:$0xff]  ;;  %v217_v40 = vld [vmem:[#allocation2 + $0x138] sm:$0xff] }
  0x3d   :  { %652 = vmatpush1.bf16.msra.mxu0 %v651_v58  ;;  %678 = vmatprep.subr.bf16.mxu1 %v677_v8  ;;  %v695_v41 = vpack.c.bf16 %v212_v38, %v210_v37  ;;  %v697_v42 = vpack.c.bf16 %v217_v40, %v215_v39  ;;  %v214_v43 = vld [vmem:[#allocation2 + $0x120] sm:$0xff]  ;;  %v216_v44 = vld [vmem:[#allocation2 + $0x130] sm:$0xff]  ;;  %v219_v45 = vld [vmem:[#allocation2 + $0x148] sm:$0xff] }
  0x3e   :  { %654 = vmatprep.subr.bf16.mxu0 %v653_v63  ;;  %v221_v46 = vld [vmem:[#allocation2 + $0x158] sm:$0xff]  ;;  %v699_v47 = vpack.c.bf16 %v216_v44, %v214_v43  ;;  %v218_v49 = vld [vmem:[#allocation2 + $0x140] sm:$0xff]  ;;  %v220_v50 = vld [vmem:[#allocation2 + $0x150] sm:$0xff] }
  0x3f   :  { %v701_v48 = vpack.c.bf16 %v221_v46, %v219_v45  ;;  %v223_v51 = vld [vmem:[#allocation2 + $0x168] sm:$0xff]  ;;  %v225_v52 = vld [vmem:[#allocation2 + $0x178] sm:$0xff]  ;;  %v703_v53 = vpack.c.bf16 %v220_v50, %v218_v49  ;;  %v222_v55 = vld [vmem:[#allocation2 + $0x160] sm:$0xff] }
  0x40   :  { %680 = vmatpush1.bf16.msra.mxu1 %v679_v15  ;;  %v705_v54 = vpack.c.bf16 %v225_v52, %v223_v51  ;;  %v224_v56 = vld [vmem:[#allocation2 + $0x170] sm:$0xff]  ;;  %v227_v57 = vld [vmem:[#allocation2 + $0x188] sm:$0xff]  ;;  %v229_v58 = vld [vmem:[#allocation2 + $0x198] sm:$0xff] }
  0x41   :  { %656 = vmatpush1.bf16.msra.mxu0 %v655_v6  ;;  %682 = vmatprep.subr.bf16.mxu1 %v681_v17  ;;  %v707_v59 = vpack.c.bf16 %v224_v56, %v222_v55  ;;  %v709_v60 = vpack.c.bf16 %v229_v58, %v227_v57  ;;  %v226_v61 = vld [vmem:[#allocation2 + $0x180] sm:$0xff]  ;;  %v228_v62 = vld [vmem:[#allocation2 + $0x190] sm:$0xff]  ;;  %v231_v63 = vld [vmem:[#allocation2 + $0x1a8] sm:$0xff] }
  0x42   :  { %658 = vmatprep.subr.bf16.mxu0 %v657_v11  ;;  %v233_v0 = vld [vmem:[#allocation2 + $0x1b8] sm:$0xff]  ;;  %v711_v1 = vpack.c.bf16 %v228_v62, %v226_v61  ;;  %v230_v3 = vld [vmem:[#allocation2 + $0x1a0] sm:$0xff]  ;;  %v232_v4 = vld [vmem:[#allocation2 + $0x1b0] sm:$0xff] }
  0x43   :  { %v713_v2 = vpack.c.bf16 %v233_v0, %v231_v63  ;;  %v235_v5 = vld [vmem:[#allocation2 + $0x1c8] sm:$0xff]  ;;  %v237_v6 = vld [vmem:[#allocation2 + $0x1d8] sm:$0xff]  ;;  %v715_v7 = vpack.c.bf16 %v232_v4, %v230_v3  ;;  %v234_v9 = vld [vmem:[#allocation2 + $0x1c0] sm:$0xff] }
  0x44   :  { %684 = vmatpush1.bf16.msra.mxu1 %v683_v22  ;;  %v717_v8 = vpack.c.bf16 %v237_v6, %v235_v5  ;;  %v236_v10 = vld [vmem:[#allocation2 + $0x1d0] sm:$0xff]  ;;  %v239_v12 = vld [vmem:[#allocation2 + $0x1e8] sm:$0xff]  ;;  %v241_v13 = vld [vmem:[#allocation2 + $0x1f8] sm:$0xff] }
  0x45   :  { %660 = vmatpush1.bf16.msra.mxu0 %v659_v16  ;;  %686 = vmatprep.subr.bf16.mxu1 %v685_v24  ;;  %v719_v11 = vpack.c.bf16 %v236_v10, %v234_v9  ;;  %v721_v14 = vpack.c.bf16 %v241_v13, %v239_v12  ;;  %v238_v15 = vld [vmem:[#allocation2 + $0x1e0] sm:$0xff]  ;;  %v240_v16 = vld [vmem:[#allocation2 + $0x1f0] sm:$0xff]  ;;  %v328_v18 = vld [vmem:[#allocation4 + $0x8] sm:$0xff] }
  0x46   :  { %v723_v17 = vpack.c.bf16 %v240_v16, %v238_v15  ;;  %v330_v19 = vld [vmem:[#allocation4 + $0x18] sm:$0xff]  ;;  %v327_v20 = vld [vmem:[#allocation4] sm:$0xff]  ;;  %v329_v22 = vld [vmem:[#allocation4 + $0x10] sm:$0xff] }
  0x47   :  { %v725_v21 = vpack.c.bf16 %v330_v19, %v328_v18  ;;  %v334_v24 = vld [vmem:[#allocation4 + $0x38] sm:$0xff]  ;;  %v727_v25 = vpack.c.bf16 %v329_v22, %v327_v20  ;;  %v331_v27 = vld [vmem:[#allocation4 + $0x20] sm:$0xff]  ;;  %v333_v28 = vld [vmem:[#allocation4 + $0x30] sm:$0xff] }
  0x48   :  { %170 = vmatmul.mubr.f32.vlgmr.msra.gmra.mrb[0].mxu0 %v60_v23  ;;  %688 = vmatpush1.bf16.msra.mxu1 %v687_v29  ;;  %v332_v23 = vld [vmem:[#allocation4 + $0x28] sm:$0xff]  ;;  %v731_v31 = vpack.c.bf16 %v333_v28, %v331_v27  ;;  %v335_v33 = vld [vmem:[#allocation4 + $0x40] sm:$0xff]  ;;  %v337_v34 = vld [vmem:[#allocation4 + $0x50] sm:$0xff] }
  0x49   :  { %690 = vmatprep.subr.bf16.mxu1 %v689_v30  ;;  %v729_v26 = vpack.c.bf16 %v334_v24, %v332_v23  ;;  %v336_v29 = vld [vmem:[#allocation4 + $0x48] sm:$0xff]  ;;  %726 = vmatprep.subr.bf16.mxu0 %v725_v21  ;;  %v338_v30 = vld [vmem:[#allocation4 + $0x58] sm:$0xff]  ;;  %v735_v37 = vpack.c.bf16 %v337_v34, %v335_v33  ;;  %v339_v39 = vld [vmem:[#allocation4 + $0x60] sm:$0xff] }
  0x4a   :  { %728 = vmatpush1.bf16.msra.mxu0 %v727_v25  ;;  %v733_v32 = vpack.c.bf16 %v338_v30, %v336_v29  ;;  %v341_v40 = vld [vmem:[#allocation4 + $0x70] sm:$0xff]  ;;  %v343_v45 = vld [vmem:[#allocation4 + $0x80] sm:$0xff]  ;;  %v368_v13 = vld [vmem:[#allocation4 + $0x148] sm:$0xff] }
  0x4b   :  { %730 = vmatprep.subr.bf16.mxu0 %v729_v26  ;;  %v739_v43 = vpack.c.bf16 %v341_v40, %v339_v39  ;;  %v345_v46 = vld [vmem:[#allocation4 + $0x90] sm:$0xff]  ;;  %v347_v51 = vld [vmem:[#allocation4 + $0xa0] sm:$0xff]  ;;  %v372_v19 = vld [vmem:[#allocation4 + $0x168] sm:$0xff] }
  0x4c   :  { %692 = vmatpush1.bf16.msra.mxu1 %v691_v35  ;;  %v340_v35 = vld [vmem:[#allocation4 + $0x68] sm:$0xff]  ;;  %v743_v49 = vpack.c.bf16 %v345_v46, %v343_v45  ;;  %v349_v52 = vld [vmem:[#allocation4 + $0xb0] sm:$0xff]  ;;  %v351_v57 = vld [vmem:[#allocation4 + $0xc0] sm:$0xff] }
  0x4d   :  { %694 = vmatprep.subr.bf16.mxu1 %v693_v36  ;;  %v342_v36 = vld [vmem:[#allocation4 + $0x78] sm:$0xff]  ;;  %v747_v55 = vpack.c.bf16 %v349_v52, %v347_v51  ;;  %v353_v58 = vld [vmem:[#allocation4 + $0xd0] sm:$0xff]  ;;  %v355_v63 = vld [vmem:[#allocation4 + $0xe0] sm:$0xff] }
  0x4e   :  { %732 = vmatpush1.bf16.msra.mxu0 %v731_v31  ;;  %v737_v38 = vpack.c.bf16 %v342_v36, %v340_v35  ;;  %v751_v61 = vpack.c.bf16 %v353_v58, %v351_v57  ;;  %v357_v0 = vld [vmem:[#allocation4 + $0xf0] sm:$0xff]  ;;  %v359_v5 = vld [vmem:[#allocation4 + $0x100] sm:$0xff]  ;;  %v374_v20 = vld [vmem:[#allocation4 + $0x178] sm:$0xff] }
  0x4f   :  { %734 = vmatprep.subr.bf16.mxu0 %v733_v32  ;;  %v755_v3 = vpack.c.bf16 %v357_v0, %v355_v63  ;;  %v361_v6 = vld [vmem:[#allocation4 + $0x110] sm:$0xff]  ;;  %v769_v22 = vpack.c.bf16 %v374_v20, %v372_v19  ;;  %v371_v23 = vld [vmem:[#allocation4 + $0x160] sm:$0xff]  ;;  %v376_v25 = vld [vmem:[#allocation4 + $0x188] sm:$0xff] }
  0x50   :  { %696 = vmatpush1.bf16.msra.mxu1 %v695_v41  ;;  %v344_v41 = vld [vmem:[#allocation4 + $0x88] sm:$0xff]  ;;  %v759_v9 = vpack.c.bf16 %v361_v6, %v359_v5  ;;  %v365_v12 = vld [vmem:[#allocation4 + $0x130] sm:$0xff]  ;;  %v378_v26 = vld [vmem:[#allocation4 + $0x198] sm:$0xff] }
  0x51   :  { %698 = vmatprep.subr.bf16.mxu1 %v697_v42  ;;  %v346_v42 = vld [vmem:[#allocation4 + $0x98] sm:$0xff]  ;;  %v369_v18 = vld [vmem:[#allocation4 + $0x150] sm:$0xff]  ;;  %v773_v28 = vpack.c.bf16 %v378_v26, %v376_v25  ;;  %v375_v29 = vld [vmem:[#allocation4 + $0x180] sm:$0xff] }
  0x52   :  { %736 = vmatpush1.bf16.msra.mxu0 %v735_v37  ;;  %v741_v44 = vpack.c.bf16 %v346_v42, %v344_v41  ;;  %v373_v24 = vld [vmem:[#allocation4 + $0x170] sm:$0xff]  ;;  %v380_v31 = vld [vmem:[#allocation4 + $0x1a8] sm:$0xff]  ;;  %v382_v32 = vld [vmem:[#allocation4 + $0x1b8] sm:$0xff]  ;;  %v95_v41 = vlaneseq }
  0x53   :  { %738 = vmatprep.subr.bf16.mxu0 %v737_v38  ;;  %v771_v27 = vpack.c.bf16 %v373_v24, %v371_v23  ;;  %v377_v30 = vld [vmem:[#allocation4 + $0x190] sm:$0xff]  ;;  %v777_v34 = vpack.c.bf16 %v382_v32, %v380_v31  ;;  %v379_v35 = vld [vmem:[#allocation4 + $0x1a0] sm:$0xff]  ;;  %v384_v37 = vld [vmem:[#allocation4 + $0x1c8] sm:$0xff] }
  0x54   :  { %700 = vmatpush1.bf16.msra.mxu1 %v699_v47  ;;  %v348_v47 = vld [vmem:[#allocation4 + $0xa8] sm:$0xff]  ;;  %v775_v33 = vpack.c.bf16 %v377_v30, %v375_v29  ;;  %v381_v36 = vld [vmem:[#allocation4 + $0x1b0] sm:$0xff]  ;;  %v386_v38 = vld [vmem:[#allocation4 + $0x1d8] sm:$0xff]  ;;  %v96_v42 = vshrl.u32 %v95_v41, 7 }
  0x55   :  { %702 = vmatprep.subr.bf16.mxu1 %v701_v48  ;;  %v350_v48 = vld [vmem:[#allocation4 + $0xb8] sm:$0xff]  ;;  %v779_v39 = vpack.c.bf16 %v381_v36, %v379_v35  ;;  %v781_v40 = vpack.c.bf16 %v386_v38, %v384_v37  ;;  %v388_v57 = vld [vmem:[#allocation4 + $0x1e8] sm:$0xff]  ;;  %v492_v63 = vld [vmem:[%s1180_s7 + $0x80] sm:$0xff] }
  0x56   :  { %740 = vmatpush1.bf16.msra.mxu0 %v739_v43  ;;  %v745_v50 = vpack.c.bf16 %v350_v48, %v348_v47  ;;  %v1052_v43 = vsub.s32 0, %v96_v42  ;;  %v1057_v45 = vsub.s32 1, %v96_v42  ;;  %v390_v58 = vld [vmem:[#allocation4 + $0x1f8] sm:$0xff]  ;;  %v495_v5 = vld [vmem:[%s1180_s7 + $0x98] sm:$0xff]  ;;  %v482_v20 = vld [vmem:[%s1180_s7 + $0x30] sm:$0xff] }
  0x57   :  { %742 = vmatprep.subr.bf16.mxu0 %v741_v44  ;;  %v93_v44 = vld [vmem:[%s1175_s2] sm:$0x3]  ;;  %v493_v0 = vld [vmem:[%s1180_s7 + $0x88] sm:$0xff]  ;;  %v503_v29 = vld [vmem:[%s1180_s7 + $0xd8] sm:$0xff] }
  0x58   :  { %704 = vmatpush1.bf16.msra.mxu1 %v703_v53  ;;  %v352_v53 = vld [vmem:[#allocation4 + $0xc8] sm:$0xff]  ;;  %v98_v46 = vrot.slane %v93_v44, %v1052_v43  ;;  %v102_v47 = vrot.slane %v93_v44, %v1057_v45  ;;  %v501_v23 = vld [vmem:[%s1180_s7 + $0xc8] sm:$0xff]  ;;  %v484_v26 = vld [vmem:[%s1180_s7 + $0x40] sm:$0xff] }
  0x59   :  { %706 = vmatprep.subr.bf16.mxu1 %v705_v54  ;;  %v354_v54 = vld [vmem:[#allocation4 + $0xd8] sm:$0xff]  ;;  %v486_v32 = vld [vmem:[%s1180_s7 + $0x50] sm:$0xff]  ;;  %v242_v38 = vld [vmem:[%s1177_s4] sm:$0x3] }
  0x5a   :  { %744 = vmatpush1.bf16.msra.mxu0 %v743_v49  ;;  %v749_v56 = vpack.c.bf16 %v354_v54, %v352_v53  ;;  %v383_v54 = vld [vmem:[#allocation4 + $0x1c0] sm:$0xff]  ;;  %v505_v35 = vld [vmem:[%s1180_s7 + $0xe8] sm:$0xff] }
  0x5b   :  { %746 = vmatprep.subr.bf16.mxu0 %v745_v50 }
  0x5c   :  { %708 = vmatpush1.bf16.msra.mxu1 %v707_v59  ;;  %v356_v59 = vld [vmem:[#allocation4 + $0xe8] sm:$0xff] }
  0x5d   :  { %710 = vmatprep.subr.bf16.mxu1 %v709_v60  ;;  %v358_v60 = vld [vmem:[#allocation4 + $0xf8] sm:$0xff] }
  0x5e   :  { %748 = vmatpush1.bf16.msra.mxu0 %v747_v55  ;;  %v753_v62 = vpack.c.bf16 %v358_v60, %v356_v59  ;;  %v385_v55 = vld [vmem:[#allocation4 + $0x1d0] sm:$0xff]  ;;  %v785_v59 = vpack.c.bf16 %v390_v58, %v388_v57  ;;  %v387_v60 = vld [vmem:[#allocation4 + $0x1e0] sm:$0xff] }
  0x5f   :  { %750 = vmatprep.subr.bf16.mxu0 %v749_v56  ;;  %v783_v56 = vpack.c.bf16 %v385_v55, %v383_v54  ;;  %v490_v55 = vld [vmem:[%s1180_s7 + $0x70] sm:$0xff]  ;;  %v391_v58 = vld [vmem:[%s1179_s6] sm:$0x3] }
  0x60   :  { %712 = vmatpush1.bf16.msra.mxu1 %v711_v1  ;;  %v360_v1 = vld [vmem:[#allocation4 + $0x108] sm:$0xff] }
  0x61   :  { %714 = vmatprep.subr.bf16.mxu1 %v713_v2  ;;  %v362_v2 = vld [vmem:[#allocation4 + $0x118] sm:$0xff] }
  0x62   :  { %752 = vmatpush1.bf16.msra.mxu0 %v751_v61  ;;  %v757_v4 = vpack.c.bf16 %v362_v2, %v360_v1  ;;  %v389_v61 = vld [vmem:[#allocation4 + $0x1f0] sm:$0xff]  ;;  %v789_v2 = vpack.c.bf16 %v493_v0, %v492_v63 }
  0x63   :  { %754 = vmatprep.subr.bf16.mxu0 %v753_v62  ;;  %v787_v62 = vpack.c.bf16 %v389_v61, %v387_v60  ;;  %v476_v1 = vld [vmem:[%s1180_s7] sm:$0xff]  ;;  %v400_v60 = vrot.slane %v391_v58, %v1057_v45 }
  0x64   :  { %716 = vmatpush1.bf16.msra.mxu1 %v715_v7  ;;  %v364_v7 = vld [vmem:[#allocation4 + $0x128] sm:$0xff] }
  0x65   :  { %718 = vmatprep.subr.bf16.mxu1 %v717_v8  ;;  %v366_v8 = vld [vmem:[#allocation4 + $0x138] sm:$0xff] }
  0x66   :  { %756 = vmatpush1.bf16.msra.mxu0 %v755_v3  ;;  %v761_v10 = vpack.c.bf16 %v366_v8, %v364_v7  ;;  %v477_v3 = vld [vmem:[%s1180_s7 + $0x8] sm:$0xff]  ;;  %v478_v8 = vld [vmem:[%s1180_s7 + $0x10] sm:$0xff] }
  0x67   :  { %758 = vmatprep.subr.bf16.mxu0 %v757_v4  ;;  %v494_v4 = vld [vmem:[%s1180_s7 + $0x90] sm:$0xff]  ;;  %v791_v6 = vpack.c.bf16 %v477_v3, %v476_v1 }
  0x68   :  { %720 = vmatpush1.bf16.msra.mxu1 %v719_v11  ;;  %v363_v11 = vld [vmem:[#allocation4 + $0x120] sm:$0xff]  ;;  %v793_v7 = vpack.c.bf16 %v495_v5, %v494_v4  ;;  %v593_v4 = vld [vmem:[%s1181_s8] ss:$0 sm:$0xff] }
  0x69   :  { %722 = vmatprep.subr.bf16.mxu1 %v721_v14  ;;  %v370_v14 = vld [vmem:[#allocation4 + $0x158] sm:$0xff]  ;;  %v763_v15 = vpack.c.bf16 %v365_v12, %v363_v11 }
  0x6a   :  { %760 = vmatpush1.bf16.msra.mxu0 %v759_v9  ;;  %v765_v16 = vpack.c.bf16 %v370_v14, %v368_v13  ;;  %v479_v9 = vld [vmem:[%s1180_s7 + $0x18] sm:$0xff]  ;;  %v497_v11 = vld [vmem:[%s1180_s7 + $0xa8] sm:$0xff]  ;;  %v480_v14 = vld [vmem:[%s1180_s7 + $0x20] sm:$0xff] }
  0x6b   :  { %762 = vmatprep.subr.bf16.mxu0 %v761_v10  ;;  %v496_v10 = vld [vmem:[%s1180_s7 + $0xa0] sm:$0xff]  ;;  %v795_v12 = vpack.c.bf16 %v479_v9, %v478_v8 }
  0x6c   :  { %724 = vmatpush1.bf16.msra.mxu1 %v723_v17  ;;  %v367_v17 = vld [vmem:[#allocation4 + $0x140] sm:$0xff]  ;;  %v797_v13 = vpack.c.bf16 %v497_v11, %v496_v10 }
  0x6d   :  { %v767_v21 = vpack.c.bf16 %v369_v18, %v367_v17  ;;  %790 = vmatprep.subr.bf16.mxu1 %v789_v2  ;;  %v499_v17 = vld [vmem:[%s1180_s7 + $0xb8] sm:$0xff] }
  0x6e   :  { %764 = vmatpush1.bf16.msra.mxu0 %v763_v15  ;;  %v481_v15 = vld [vmem:[%s1180_s7 + $0x28] sm:$0xff] }
  0x6f   :  { %766 = vmatprep.subr.bf16.mxu0 %v765_v16  ;;  %v498_v16 = vld [vmem:[%s1180_s7 + $0xb0] sm:$0xff]  ;;  %v799_v18 = vpack.c.bf16 %v481_v15, %v480_v14 }
  0x70   :  { %v801_v19 = vpack.c.bf16 %v499_v17, %v498_v16 }
  0x72   :  { %768 = vmatpush1.bf16.msra.mxu0 %v767_v21  ;;  %v483_v21 = vld [vmem:[%s1180_s7 + $0x38] sm:$0xff] }
  0x73   :  { %770 = vmatprep.subr.bf16.mxu0 %v769_v22  ;;  %v500_v22 = vld [vmem:[%s1180_s7 + $0xc0] sm:$0xff]  ;;  %v803_v24 = vpack.c.bf16 %v483_v21, %v482_v20 }
  0x74   :  { %v805_v25 = vpack.c.bf16 %v501_v23, %v500_v22 }
  0x76   :  { %772 = vmatpush1.bf16.msra.mxu0 %v771_v27  ;;  %v485_v27 = vld [vmem:[%s1180_s7 + $0x48] sm:$0xff] }
  0x77   :  { %774 = vmatprep.subr.bf16.mxu0 %v773_v28  ;;  %v502_v28 = vld [vmem:[%s1180_s7 + $0xd0] sm:$0xff]  ;;  %v807_v30 = vpack.c.bf16 %v485_v27, %v484_v26 }
  0x78   :  { %v809_v31 = vpack.c.bf16 %v503_v29, %v502_v28 }
  0x7a   :  { %776 = vmatpush1.bf16.msra.mxu0 %v775_v33  ;;  %v487_v33 = vld [vmem:[%s1180_s7 + $0x58] sm:$0xff] }
  0x7b   :  { %778 = vmatprep.subr.bf16.mxu0 %v777_v34  ;;  %v504_v34 = vld [vmem:[%s1180_s7 + $0xe0] sm:$0xff]  ;;  %v811_v36 = vpack.c.bf16 %v487_v33, %v486_v32 }
  0x7c   :  { %v813_v37 = vpack.c.bf16 %v505_v35, %v504_v34 }
  0x7e   :  { %780 = vmatpush1.bf16.msra.mxu0 %v779_v39  ;;  %v247_v39 = vrot.slane %v242_v38, %v1052_v43 }
  0x7f   :  { %782 = vmatprep.subr.bf16.mxu0 %v781_v40  ;;  %v251_v40 = vrot.slane %v242_v38, %v1057_v45 }
  0x82   :  { %784 = vmatpush1.bf16.msra.mxu0 %v783_v56  ;;  %v491_v56 = vld [vmem:[%s1180_s7 + $0x78] sm:$0xff] }
  0x83   :  { %786 = vmatprep.subr.bf16.mxu0 %v785_v59  ;;  %v819_v57 = vpack.c.bf16 %v491_v56, %v490_v55  ;;  %v396_v59 = vrot.slane %v391_v58, %v1052_v43 }
  0x86   :  { %788 = vmatpush1.bf16.msra.mxu0 %v787_v62 }
 0x11b   :  { %v171_v48 = vpop.f32.mrb[0].mxu0 }
 0x11c   :  { %v172_v49 = vadd.f32 %v171_v48, %v98_v46  ;;  %v173_v50 = vpop.f32.mrb[1].mxu0 }
 0x11d   :  { %v174_v51 = vadd.f32 %v173_v50, %v102_v47  ;;  %v489_v50 = vld [vmem:[%s1180_s7 + $0x68] sm:$0xff] }
 0x11e   :  { %v176_v53 = vmax.f32 %v172_v49, 0.0  ;;  %v488_v49 = vld [vmem:[%s1180_s7 + $0x60] sm:$0xff] }
 0x11f   :  { %v177_v52 = vmax.f32 %v174_v51, 0.0  ;;  %v815_v51 = vpack.c.bf16 %v489_v50, %v488_v49 }
 0x121   :  { %318 = vmatprep.mubr.f32.mxu1 %v177_v52  ;;  %v506_v52 = vld [vmem:[%s1180_s7 + $0xf0] sm:$0xff] }
 0x122   :  { %319 = vmatmul.mubr.f32.vlgmr.msra.gmra.mrb[0].mxu1 %v176_v53  ;;  %v507_v53 = vld [vmem:[%s1180_s7 + $0xf8] sm:$0xff] }
 0x123   :  { %792 = vmatpush3.bf16.msra.mxu1 %v791_v6  ;;  %v817_v54 = vpack.c.bf16 %v507_v53, %v506_v52 }
 0x124   :  { %794 = vmatprep.subr.bf16.mxu1 %v793_v7 }
 0x127   :  { %796 = vmatpush3.bf16.msra.mxu1 %v795_v12 }
 0x128   :  { %798 = vmatprep.subr.bf16.mxu1 %v797_v13 }
 0x12b   :  { %800 = vmatpush3.bf16.msra.mxu1 %v799_v18 }
 0x12c   :  { %802 = vmatprep.subr.bf16.mxu1 %v801_v19 }
 0x12f   :  { %804 = vmatpush3.bf16.msra.mxu1 %v803_v24 }
 0x130   :  { %806 = vmatprep.subr.bf16.mxu1 %v805_v25 }
 0x133   :  { %808 = vmatpush3.bf16.msra.mxu1 %v807_v30 }
 0x134   :  { %810 = vmatprep.subr.bf16.mxu1 %v809_v31 }
 0x137   :  { %812 = vmatpush3.bf16.msra.mxu1 %v811_v36 }
 0x138   :  { %814 = vmatprep.subr.bf16.mxu1 %v813_v37 }
 0x13b   :  { %816 = vmatpush3.bf16.msra.mxu1 %v815_v51 }
 0x13c   :  { %818 = vmatprep.subr.bf16.mxu1 %v817_v54 }
 0x13f   :  { %820 = vmatpush3.bf16.msra.mxu1 %v819_v57 }
 0x1f5   :  { %v320_v41 = vpop.f32.mrb[0].mxu1 }
 0x1f6   :  { %v321_v42 = vadd.f32 %v320_v41, %v247_v39  ;;  %v322_v44 = vpop.f32.mrb[1].mxu1 }
 0x1f7   :  { %v323_v46 = vadd.f32 %v322_v44, %v251_v40 }
 0x1f8   :  { %v325_v48 = vmax.f32 %v321_v42, 0.0 }
 0x1f9   :  { %v326_v47 = vmax.f32 %v323_v46, 0.0 }
 0x1fb   :  { %467 = vmatprep.mubr.f32.mxu0 %v326_v47 }
 0x1fc   :  { %468 = vmatmul.mubr.f32.vlgmr.msra.gmra.mrb[2].mxu0 %v325_v48 }
 0x2cf   :  { %v469_v61 = vpop.f32.mrb[2].mxu0 }
 0x2d0   :  { %v470_v62 = vadd.f32 %v469_v61, %v396_v59  ;;  %v471_v63 = vpop.f32.mrb[3].mxu0 }
 0x2d1   :  { %v472_v0 = vadd.f32 %v471_v63, %v400_v60 }
 0x2d2   :  { %v474_v2 = vmax.f32 %v470_v62, 0.0 }
 0x2d3   :  { %v475_v1 = vmax.f32 %v472_v0, 0.0 }
 0x2d5   :  { %579 = vmatprep.mubr.f32.mxu1 %v475_v1 }
 0x2d6   :  { %580 = vmatmul.mubr.f32.vlgmr.msra.gmra.mrb[2].mxu1 %v474_v2 }
 0x3a9   :  { %v626_v3 = vpop.f32.mrb[2].mxu1 }
 0x3aa   :  { %v627_v5 = vpop.f32.mrb[3].mxu1 }
 0x3ab   :  { %v628_v6 = vadd.f32 %v627_v5, %v626_v3 }
 0x3ad   :  { %v582_v7 = vadd.f32 %v628_v6, %v593_v4 }
 0x3af   :  { %586 = vst.msk [vmem:[%s1182_s9] sm:$0xff] %vm585_vm0, %v582_v7 }
 0x3b0   :  { %591 = vsyncpa [#allocation3], 1 }
 0x3b1   :  { %592 = vsyncpa [#allocation5], 1 }

</bundles_post_ra>
